<compile_context>
chip_gen: v7x
topology: tpu7x:2x2x1
jax: 0.10.0
libtpu: 0.0.40
codegen_flags: <defaults>
</compile_context>

<pallas_src>
import functools
import numpy as np
import jax
import jax.numpy as jnp
from jax.experimental import pallas as pl
from jax.experimental.pallas import tpu as pltpu

# ------------------- mit_b4 / SegFormerHead hyper-parameters -------------------
EMBED_DIMS      = [64, 128, 320, 512]
NUM_HEADS       = [1, 2, 5, 8]
MLP_RATIOS      = [4, 4, 4, 4]
DEPTHS          = [3, 8, 27, 3]
SR_RATIOS       = [8, 4, 2, 1]
PATCH_SIZES     = [7, 3, 3, 3]
PATCH_STRIDES   = [4, 2, 2, 2]
IN_CHS          = [3, 64, 128, 320]
EMBEDDING_DIM   = 768
NUM_CLASSES     = 150
NUM_CLASSES_PAD = 256          # lane-dense output width for the pred matmul
MAX_TIMES       = 4


def _default_vmem_limit():
    # v7x has 64 MiB of physical VMEM per TensorCore; leave generous headroom for the pipeline's
    # double buffers and compiler temps.  v5e/v6e (128 MiB) are capped at 96 MiB.
    cap = 64 * 1024 * 1024
    try:
        cap = int(pltpu.get_tpu_info().vmem_capacity_bytes)
    except Exception:
        pass
    return min(96 * 1024 * 1024, max(32 * 1024 * 1024, cap - 24 * 1024 * 1024))


_VMEM_LIMIT = _default_vmem_limit()


def _round_up(x, m):
    return ((x + m - 1) // m) * m


def _row_tile(m):
    """Pick an M-tile (multiple of 8) and the padded M so a tile always exists."""
    if m >= 1024:
        tm = 512
    elif m >= 256:
        tm = 256
    else:
        tm = _round_up(m, 8)
    return tm, _round_up(m, tm)


def _k_tile(k):
    if k <= 1024:
        return k
    for t in (1024, 768, 640, 576, 512, 384, 256, 128):
        if k % t == 0:
            return t
    return k


def _n_tile(n):
    if n <= 2048:
        return n
    for t in (2048, 1536, 1024, 768, 512, 384, 256, 128):
        if n % t == 0:
            return t
    return n


# =============================== Pallas kernels ===============================

def _mm_kernel(*refs, act, has_res, has_ln, ln_eps):
    """K-accumulating tile matmul (bf16 MXU, f32 acc).

    Optional LayerNorm prologue (full feature dim must be a single K tile) and
    optional fused residual add + bias + activation epilogue on the last K step.
    """
    idx = 0
    x_ref = refs[idx]; idx += 1
    if has_ln:
        g_ref = refs[idx]; bln_ref = refs[idx + 1]; idx += 2
    w_ref = refs[idx]; b_ref = refs[idx + 1]; idx += 2
    if has_res:
        res_ref = refs[idx]; idx += 1
    o_ref = refs[idx]; acc_ref = refs[idx + 1]

    k = pl.program_id(2)
    nk = pl.num_programs(2)

    @pl.when(k == 0)
    def _():
        acc_ref[...] = jnp.zeros_like(acc_ref)

    if has_ln:
        xv = x_ref[...].astype(jnp.float32)
        mu = jnp.mean(xv, axis=-1, keepdims=True)
        xc = xv - mu
        var = jnp.mean(xc * xc, axis=-1, keepdims=True)
        xn = xc * jax.lax.rsqrt(var + ln_eps)
        xb = (xn * g_ref[...] + bln_ref[...]).astype(jnp.bfloat16)
    else:
        xb = x_ref[...]            # already bf16 (cast on the host -> half the DMA bytes)
    acc_ref[...] += jnp.dot(xb, w_ref[...], preferred_element_type=jnp.float32)

    @pl.when(k == nk - 1)
    def _():
        r = acc_ref[...] + b_ref[...]
        if act == "relu":
            r = jnp.maximum(r, 0.0)
        if has_res:
            r = r + res_ref[...].astype(jnp.float32)
        o_ref[...] = r.astype(o_ref.dtype)


def matmul_bias(x, w, b, act="none", out_dtype=jnp.float32, residual=None, ln=None):
    """(M, K) @ (K, N) + b, with optional fused LayerNorm prologue / residual-add epilogue."""
    M, K = x.shape
    _, N = w.shape
    TK = _k_tile(K)
    TN = _n_tile(N)
    TM, Mp = _row_tile(M)
    if ln is not None:
        assert TK == K, "LayerNorm prologue needs the full feature dim in one K tile"
    else:
        x = x.astype(jnp.bfloat16)          # host-side cast: halves the x-tile HBM->VMEM traffic
    if Mp != M:
        x = jnp.pad(x, ((0, Mp - M), (0, 0)))
        if residual is not None:
            residual = jnp.pad(residual, ((0, Mp - M), (0, 0)))
    wb = w.astype(jnp.bfloat16)             # halves weight DMA; f32 accumulation on the MXU

    inputs = [x]
    in_specs = [pl.BlockSpec((TM, TK), lambda i, j, k: (i, k))]
    if ln is not None:
        inputs += [ln["g"], ln["b"]]
        in_specs += [pl.BlockSpec((1, K), lambda i, j, k: (0, 0)),
                     pl.BlockSpec((1, K), lambda i, j, k: (0, 0))]
    inputs += [wb, b]
    in_specs += [pl.BlockSpec((TK, TN), lambda i, j, k: (k, j)),
                 pl.BlockSpec((1, TN), lambda i, j, k: (0, j))]
    if residual is not None:
        inputs.append(residual)
        in_specs.append(pl.BlockSpec((TM, TN), lambda i, j, k: (i, j)))

    out = pl.pallas_call(
        functools.partial(_mm_kernel, act=act,
                          has_res=residual is not None,
                          has_ln=ln is not None,
                          ln_eps=float((ln or {}).get("eps", 1e-6))),
        out_shape=jax.ShapeDtypeStruct((Mp, N), out_dtype),
        grid=(Mp // TM, N // TN, K // TK),
        in_specs=in_specs,
        out_specs=pl.BlockSpec((TM, TN), lambda i, j, k: (i, j)),
        scratch_shapes=[pltpu.VMEM((TM, TN), jnp.float32)],
        compiler_params=pltpu.CompilerParams(
            dimension_semantics=("parallel", "parallel", "arbitrary"),
            vmem_limit_bytes=_VMEM_LIMIT),
    )(*inputs)
    if Mp != M:
        out = out[:M]
    return out


def _ln_kernel(x_ref, g_ref, b_ref, o_ref, *, eps):
    x = x_ref[...].astype(jnp.float32)      # elementwise math stays f32 (v5e has no bf16 VPU)
    mu = jnp.mean(x, axis=-1, keepdims=True)
    xc = x - mu
    var = jnp.mean(xc * xc, axis=-1, keepdims=True)
    y = xc * jax.lax.rsqrt(var + eps)
    o_ref[...] = (y * g_ref[...] + b_ref[...]).astype(o_ref.dtype)


def layernorm(x, g, b, eps, out_dtype=jnp.float32):
    M, C = x.shape
    TM, Mp = _row_tile(M)
    if Mp != M:
        x = jnp.pad(x, ((0, Mp - M), (0, 0)))
    out = pl.pallas_call(
        functools.partial(_ln_kernel, eps=eps),
        out_shape=jax.ShapeDtypeStruct((Mp, C), out_dtype),
        grid=(Mp // TM,),
        in_specs=[
            pl.BlockSpec((TM, C), lambda i: (i, 0)),
            pl.BlockSpec((1, C), lambda i: (0, 0)),
            pl.BlockSpec((1, C), lambda i: (0, 0)),
        ],
        out_specs=pl.BlockSpec((TM, C), lambda i: (i, 0)),
        compiler_params=pltpu.CompilerParams(
            dimension_semantics=("parallel",),
            vmem_limit_bytes=_VMEM_LIMIT),
    )(x, g, b)
    if Mp != M:
        out = out[:M]
    return out


def _attn_kernel(q_ref, kv_ref, o_ref, *, num_heads, scale):
    """Multi-head softmax(q @ k^T * scale) @ v for one (batch, q-tile).

    Heads live in contiguous 64-wide column strips of the row-major q/kv matmul outputs, so no
    host-side transposes are needed; the heads are looped in-kernel with static slices and the
    output block is written lane-dense (full C wide)."""
    C = q_ref.shape[-1]
    d = C // num_heads
    q = q_ref[0]                                    # (TQ, C)  bf16
    kv = kv_ref[0]                                  # (M, 2C)  bf16
    for h in range(num_heads):
        qh = q[:, h * d:(h + 1) * d]
        kh = kv[:, h * d:(h + 1) * d]
        vh = kv[:, C + h * d:C + (h + 1) * d]
        s = jax.lax.dot_general(qh, kh, (((1,), (1,)), ((), ())),
                                preferred_element_type=jnp.float32) * scale   # (TQ, M)
        m = jnp.max(s, axis=-1, keepdims=True)
        p = jnp.exp(s - m)
        denom = jnp.sum(p, axis=-1, keepdims=True)
        p = p * pl.reciprocal(denom, approx=True)
        oh = jnp.dot(p.astype(vh.dtype), vh, preferred_element_type=jnp.float32)
        o_ref[0, :, h * d:(h + 1) * d] = oh.astype(o_ref.dtype)


def attention_pallas(q, kv, num_heads, scale, out_dtype=jnp.bfloat16):
    # q: (B, N, C) bf16 (row-major tokens); kv: (B, M, 2C) bf16 (K strips then V strips).
    B, N, C = q.shape
    M = kv.shape[1]
    if N >= 1024:
        TQ = 512
    elif N >= 256:
        TQ = 256
    else:
        TQ = N
    Np = _round_up(N, TQ)
    if Np != N:
        q = jnp.pad(q, ((0, 0), (0, Np - N), (0, 0)))
    out = pl.pallas_call(
        functools.partial(_attn_kernel, num_heads=num_heads, scale=scale),
        out_shape=jax.ShapeDtypeStruct((B, Np, C), out_dtype),
        grid=(B, Np // TQ),
        in_specs=[
            pl.BlockSpec((1, TQ, C), lambda b, i: (b, i, 0)),
            pl.BlockSpec((1, M, 2 * C), lambda b, i: (b, 0, 0)),
        ],
        out_specs=pl.BlockSpec((1, TQ, C), lambda b, i: (b, i, 0)),
        compiler_params=pltpu.CompilerParams(
            dimension_semantics=("parallel", "parallel"),
            vmem_limit_bytes=_VMEM_LIMIT),
    )(q, kv)
    if Np != N:
        out = out[:, :N]
    return out


def _dwconv_gelu_kernel(x_ref, w_ref, b_ref, o_ref):
    """Depthwise 3x3 (stride 1, pre-padded input) + bias + GELU, NHWC, channel-tiled."""
    _, H, W, TC = o_ref.shape
    acc = jnp.zeros((H, W, TC), jnp.float32)
    for kh in range(3):
        for kw in range(3):
            tap = x_ref[0, kh:kh + H, kw:kw + W, :].astype(jnp.float32)
            acc = acc + tap * w_ref[kh * 3 + kw:kh * 3 + kw + 1, :]
    acc = acc + b_ref[...]
    # TODO(synk): PyTorch nn.GELU() is exact (erf); the tanh approximation is used here for
    # guaranteed Mosaic lowering (difference ~1e-3, does not change the argmax mask).
    c0 = 0.7978845608028654
    g = 0.5 * acc * (1.0 + jnp.tanh(c0 * (acc + 0.044715 * acc * acc * acc)))
    o_ref[0] = g.astype(o_ref.dtype)


def dwconv_gelu(x_nhwc, w9c, b1c, out_dtype=jnp.bfloat16):
    B, H, W, C = x_nhwc.shape
    in_b = jnp.dtype(x_nhwc.dtype).itemsize
    out_b = jnp.dtype(out_dtype).itemsize
    budget = max(8 * 1024 * 1024, _VMEM_LIMIT // 2)
    TC = C
    for t in (C, 512, 256, 128):
        if t <= C and C % t == 0:
            TC = t
            need = (2 * (H + 2) * (W + 2) * t * in_b      # double-buffered input
                    + 2 * H * W * t * out_b               # double-buffered output
                    + H * W * t * 4)                      # f32 accumulator temp
            if need <= budget:
                break
    # TODO(synk): for very large H,W additionally tile H with a 1-row halo (VMEM + megacore on v7x).
    xp = jnp.pad(x_nhwc, ((0, 0), (1, 1), (1, 1), (0, 0)))
    return pl.pallas_call(
        _dwconv_gelu_kernel,
        out_shape=jax.ShapeDtypeStruct((B, H, W, C), out_dtype),
        grid=(B, C // TC),
        in_specs=[
            pl.BlockSpec((1, H + 2, W + 2, TC), lambda b, c: (b, 0, 0, c)),
            pl.BlockSpec((9, TC), lambda b, c: (0, c)),
            pl.BlockSpec((1, TC), lambda b, c: (0, c)),
        ],
        out_specs=pl.BlockSpec((1, H, W, TC), lambda b, c: (b, 0, 0, c)),
        compiler_params=pltpu.CompilerParams(
            dimension_semantics=("parallel", "parallel"),
            vmem_limit_bytes=_VMEM_LIMIT),
    )(xp, w9c, b1c)


# --------------------------- bilinear resize kernels ---------------------------

def _resize_rows_kernel(mh_ref, x_ref, o_ref):
    """Row (height) mix: (TOH, H) @ (H, TWC) - channels stay lane-dense; lane axis is tiled."""
    x = x_ref[0].astype(jnp.float32)
    o_ref[0] = jnp.dot(mh_ref[...], x, preferred_element_type=jnp.float32).astype(o_ref.dtype)


def _resize_cols_kernel(mw_ref, x_ref, o_ref):
    """Column (width) mix per row: (OW, W) @ (W, C) for each of the TR rows in the block."""
    mw = mw_ref[...]
    TR = x_ref.shape[0]

    @pl.loop(0, TR)
    def _(r):
        t = x_ref[r].astype(jnp.float32)                       # (W, C)
        o_ref[r] = jnp.dot(mw, t,
                           preferred_element_type=jnp.float32).astype(o_ref.dtype)


def _resize_cols_argmax_kernel(mw_ref, x_ref, o_ref, *, num_valid):
    """Column mix + 'slice to num_valid classes + argmax' fused: writes int32 class indices."""
    mw = mw_ref[...]                                           # (OW, W) f32
    TR = x_ref.shape[0]

    @pl.loop(0, TR)
    def _(r):
        t = x_ref[r].astype(jnp.float32)                       # (W, Cp)
        logits = jnp.dot(mw, t, preferred_element_type=jnp.float32)      # (OW, Cp)
        col = jax.lax.broadcasted_iota(jnp.int32, logits.shape, 1)
        lv = jnp.where(col < num_valid, logits, jnp.float32(-3.0e38))
        m = jnp.max(lv, axis=-1, keepdims=True)
        idxf = jnp.where(lv >= m, col.astype(jnp.float32), jnp.float32(1e9))
        # first index achieving the max (matches argmax tie-breaking)
        o_ref[r] = jnp.min(idxf, axis=-1, keepdims=True).astype(jnp.int32)   # (OW, 1)


def _bilinear_matrix(out_size, in_size):
    """PyTorch bilinear, align_corners=False."""
    M = np.zeros((out_size, in_size), np.float32)
    if in_size == 1:
        M[:, 0] = 1.0
        return M
    scale = in_size / out_size
    for o in range(out_size):
        src = max((o + 0.5) * scale - 0.5, 0.0)
        x0 = min(int(np.floor(src)), in_size - 1)
        x1 = min(x0 + 1, in_size - 1)
        lam = src - x0
        M[o, x0] += 1.0 - lam
        M[o, x1] += lam
    return M


def _height_mix(x, out_h, out_dtype):
    """Height bilinear mix, channels-last: (B, H, W, C) -> (B, out_h, W*C)."""
    B, H, W, C = x.shape
    WC = W * C
    x2 = x.reshape(B, H, WC)
    if H == 1:
        return jnp.broadcast_to(x2.astype(out_dtype), (B, out_h, WC))
    src_b = jnp.dtype(x.dtype).itemsize
    out_b = jnp.dtype(out_dtype).itemsize

    # lane (W*C) tiling keeps each double-buffered slab small (needed on v7x's 64 MiB VMEM).
    TWC = WC
    while TWC % 2 == 0 and (TWC // 2) % 128 == 0 and H * TWC * src_b > (4 << 20):
        TWC //= 2
    toh_max = _round_up(out_h, 8)
    TOH = 8
    for t in (512, 256, 128, 64, 32, 16, 8):
        if t <= toh_max and t * TWC * out_b <= (4 << 20):
            TOH = t
            break
    OHp = _round_up(out_h, TOH)
    mh_np = np.zeros((OHp, H), np.float32)
    mh_np[:out_h] = _bilinear_matrix(out_h, H)
    mh = jnp.asarray(mh_np)

    y = pl.pallas_call(
        _resize_rows_kernel,
        out_shape=jax.ShapeDtypeStruct((B, OHp, WC), out_dtype),
        grid=(B, OHp // TOH, WC // TWC),
        in_specs=[
            pl.BlockSpec((TOH, H), lambda b, i, j: (i, 0)),
            pl.BlockSpec((1, H, TWC), lambda b, i, j: (b, 0, j)),
        ],
        out_specs=pl.BlockSpec((1, TOH, TWC), lambda b, i, j: (b, i, j)),
        compiler_params=pltpu.CompilerParams(
            dimension_semantics=("parallel", "parallel", "parallel"),
            vmem_limit_bytes=_VMEM_LIMIT),
    )(mh, x2)
    if OHp != out_h:
        y = y[:, :out_h]
    return y


def _pick_row_tile(R, per_row_bytes, budget=12 * 1024 * 1024):
    cap = max(1, budget // max(1, per_row_bytes))
    TR = 1
    for t in (256, 128, 64, 32, 16, 8, 4, 2, 1):
        if t <= cap:
            TR = t
            break
    return min(TR, _round_up(R, 8))


def bilinear_resize_nhwc(x, out_h, out_w, out_dtype=jnp.float32):
    """Separable bilinear resize, channels-last (no NCHW transposes)."""
    B, H, W, C = x.shape
    if (H, W) == (out_h, out_w):
        return x.astype(out_dtype)
    y1 = _height_mix(x, out_h, jnp.bfloat16)                   # (B, out_h, W*C)
    R = B * out_h
    rows = y1.reshape(R, W, C)
    if W == 1:
        y2 = jnp.broadcast_to(rows, (R, out_w, C)).astype(out_dtype)
        return y2.reshape(B, out_h, out_w, C)

    mw = jnp.asarray(_bilinear_matrix(out_w, W))                # (OW, W)
    per_row = W * C * 2 + out_w * C * jnp.dtype(out_dtype).itemsize
    TR = _pick_row_tile(R, per_row)
    Rp = _round_up(R, TR)
    if Rp != R:
        rows = jnp.pad(rows, ((0, Rp - R), (0, 0), (0, 0)))
    y2 = pl.pallas_call(
        _resize_cols_kernel,
        out_shape=jax.ShapeDtypeStruct((Rp, out_w, C), out_dtype),
        grid=(Rp // TR,),
        in_specs=[
            pl.BlockSpec((out_w, W), lambda i: (0, 0)),
            pl.BlockSpec((TR, W, C), lambda i: (i, 0, 0)),
        ],
        out_specs=pl.BlockSpec((TR, out_w, C), lambda i: (i, 0, 0)),
        compiler_params=pltpu.CompilerParams(
            dimension_semantics=("parallel",),
            vmem_limit_bytes=_VMEM_LIMIT),
    )(mw, rows)
    if Rp != R:
        y2 = y2[:R]
    return y2.reshape(B, out_h, out_w, C)


def bilinear_resize_argmax(x, out_h, out_w, num_valid):
    """Bilinear resize (align_corners=False) fused with argmax over the first num_valid channels.

    x: (B, h, w, Cp) logits (classes padded to Cp lanes).  Returns (B, out_h, out_w) int32."""
    B, H, W, Cp = x.shape
    y1 = _height_mix(x, out_h, jnp.bfloat16)                    # (B, out_h, W*Cp) bf16
    R = B * out_h
    rows = y1.reshape(R, W, Cp)

    mw = jnp.asarray(_bilinear_matrix(out_w, W))                 # (OW, W); handles W == 1 too
    per_row = W * Cp * 2 + out_w * 4
    TR = _pick_row_tile(R, per_row, budget=8 * 1024 * 1024)
    Rp = _round_up(R, TR)
    if Rp != R:
        rows = jnp.pad(rows, ((0, Rp - R), (0, 0), (0, 0)))
    out = pl.pallas_call(
        functools.partial(_resize_cols_argmax_kernel, num_valid=num_valid),
        out_shape=jax.ShapeDtypeStruct((Rp, out_w, 1), jnp.int32),
        grid=(Rp // TR,),
        in_specs=[
            pl.BlockSpec((out_w, W), lambda i: (0, 0)),
            pl.BlockSpec((TR, W, Cp), lambda i: (i, 0, 0)),
        ],
        out_specs=pl.BlockSpec((TR, out_w, 1), lambda i: (i, 0, 0)),
        compiler_params=pltpu.CompilerParams(
            dimension_semantics=("parallel",),
            vmem_limit_bytes=_VMEM_LIMIT),
    )(mw, rows)
    if Rp != R:
        out = out[:R]
    return out.reshape(B, out_h, out_w)


# =============================== JAX glue ===============================

def im2col(x_nhwc, kh, kw, stride, pad):
    """Extract conv patches (materialized in bf16); feature order = (kh, kw, cin), cin fastest."""
    # TODO(synk): implicit GEMM (in-kernel patch gathering) would avoid materializing the
    # kh*kw-fold im2col expansion in HBM; patches are built with plain-JAX slicing here.
    x_nhwc = x_nhwc.astype(jnp.bfloat16)
    if pad > 0:
        x_nhwc = jnp.pad(x_nhwc, ((0, 0), (pad, pad), (pad, pad), (0, 0)))
    B, Hp, Wp, C = x_nhwc.shape
    Ho = (Hp - kh) // stride + 1
    Wo = (Wp - kw) // stride + 1
    cols = []
    for i in range(kh):
        for j in range(kw):
            cols.append(x_nhwc[:, i:i + stride * Ho:stride, j:j + stride * Wo:stride, :])
    return jnp.concatenate(cols, axis=-1), Ho, Wo


def conv2d_im2col(x_nhwc, w, b, kh, kw, stride, pad, act="none", out_dtype=jnp.float32):
    B = x_nhwc.shape[0]
    patches, Ho, Wo = im2col(x_nhwc, kh, kw, stride, pad)
    y = matmul_bias(patches.reshape(B * Ho * Wo, -1), w, b, act=act, out_dtype=out_dtype)
    return y, Ho, Wo  # rows ordered (b, ho, wo)


# =============================== model pieces ===============================

def patch_embed_forward(p, x_nhwc, patch, stride):
    y, Ho, Wo = conv2d_im2col(x_nhwc, p["proj"]["w"], p["proj"]["b"],
                              patch, patch, stride, patch // 2, out_dtype=jnp.float32)
    y = layernorm(y, p["norm"]["g"], p["norm"]["b"], eps=1e-5, out_dtype=jnp.float32)
    return y, Ho, Wo                      # (B*Ho*Wo, C) f32 residual stream


def attention_forward(p, h_norm, x_res, B, N, C, H, W, num_heads, sr_ratio):
    """h_norm: (B*N, C) bf16 = LN1 output; x_res: (B*N, C) f32 residual stream.
    Returns the new residual stream (residual add fused into the proj matmul)."""
    d = C // num_heads
    scale = d ** (-0.5)
    q = matmul_bias(h_norm, p["q"]["w"], p["q"]["b"], out_dtype=jnp.bfloat16)      # (B*N, C)
    if sr_ratio > 1:
        x_nhwc = h_norm.reshape(B, H, W, C)                                        # row-major tokens
        xr, Ho, Wo = conv2d_im2col(x_nhwc, p["sr"]["w"], p["sr"]["b"],
                                   sr_ratio, sr_ratio, sr_ratio, 0, out_dtype=jnp.float32)
        xr = layernorm(xr, p["norm"]["g"], p["norm"]["b"], eps=1e-5, out_dtype=jnp.bfloat16)
        Mtok = Ho * Wo
        kv_in = xr
    else:
        Mtok = N
        kv_in = h_norm
    kv = matmul_bias(kv_in, p["kv"]["w"], p["kv"]["b"], out_dtype=jnp.bfloat16)    # (B*M, 2C)
    o = attention_pallas(q.reshape(B, N, C), kv.reshape(B, Mtok, 2 * C),
                         num_heads, scale, out_dtype=jnp.bfloat16)                 # (B, N, C)
    out = matmul_bias(o.reshape(B * N, C), p["proj"]["w"], p["proj"]["b"],
                      residual=x_res, out_dtype=jnp.float32)                       # fused x + attn
    return out


def mlp_forward(p, norm2, x_res, B, N, C, H, W):
    """LayerNorm2 fused as fc1 prologue; residual add fused into fc2 epilogue."""
    hid = p["fc1"]["w"].shape[1]
    h = matmul_bias(x_res, p["fc1"]["w"], p["fc1"]["b"], out_dtype=jnp.bfloat16,
                    ln={"g": norm2["g"], "b": norm2["b"], "eps": 1e-6})
    h = dwconv_gelu(h.reshape(B, H, W, hid), p["dw_w"], p["dw_b"], out_dtype=jnp.bfloat16)
    out = matmul_bias(h.reshape(B * N, hid), p["fc2"]["w"], p["fc2"]["b"],
                      residual=x_res, out_dtype=jnp.float32)                       # fused x + mlp
    return out


def block_forward(p, x2d, B, N, C, H, W, num_heads, sr_ratio):
    h1 = layernorm(x2d, p["norm1"]["g"], p["norm1"]["b"], eps=1e-6, out_dtype=jnp.bfloat16)
    x2d = attention_forward(p["attn"], h1, x2d, B, N, C, H, W, num_heads, sr_ratio)
    x2d = mlp_forward(p["mlp"], p["norm2"], x2d, B, N, C, H, W)
    return x2d


def backbone_forward(p, x_nhwc):
    feats = []
    cur = x_nhwc
    B = x_nhwc.shape[0]
    for s in range(4):
        sp = p["stages"][s]
        tok, Hs, Ws = patch_embed_forward(sp["patch_embed"], cur, PATCH_SIZES[s], PATCH_STRIDES[s])
        C = EMBED_DIMS[s]
        N = Hs * Ws
        for bp in sp["blocks"]:
            tok = block_forward(bp, tok, B, N, C, Hs, Ws, NUM_HEADS[s], SR_RATIOS[s])
        tok = layernorm(tok, sp["norm"]["g"], sp["norm"]["b"], eps=1e-6, out_dtype=jnp.bfloat16)
        cur = tok.reshape(B, Hs, Ws, C)                 # NHWC feature map; next-stage input
        feats.append(cur)
    return feats


def decode_head_forward(p, feats):
    c1, c2, c3, c4 = feats                              # NHWC bf16
    B, h1, w1, _ = c1.shape

    def mlp_head(pp, c):
        _, h, w, C = c.shape
        y = matmul_bias(c.reshape(B * h * w, C), pp["w"], pp["b"], out_dtype=jnp.bfloat16)
        return y.reshape(B, h, w, EMBEDDING_DIM)

    _c4 = bilinear_resize_nhwc(mlp_head(p["linear_c4"], c4), h1, w1, out_dtype=jnp.bfloat16)
    _c3 = bilinear_resize_nhwc(mlp_head(p["linear_c3"], c3), h1, w1, out_dtype=jnp.bfloat16)
    _c2 = bilinear_resize_nhwc(mlp_head(p["linear_c2"], c2), h1, w1, out_dtype=jnp.bfloat16)
    _c1 = mlp_head(p["linear_c1"], c1)
    _c = jnp.concatenate([_c4, _c3, _c2, _c1], axis=-1)            # (B, h1, w1, 4*768)

    x = _c.reshape(B * h1 * w1, 4 * EMBEDDING_DIM)
    # linear_fuse: 1x1 conv (no bias) + eval-mode BatchNorm (folded into weight) + ReLU
    x = matmul_bias(x, p["fuse"]["w"], p["fuse"]["b"], act="relu", out_dtype=jnp.bfloat16)
    # linear_pred: 1x1 conv, 150 classes padded to 256 lanes (dead lanes masked off in the argmax)
    # TODO(synk): on v7x the decode-head weights could be stored fp8 with per-channel scales.
    pw = jnp.pad(p["pred"]["w"], ((0, 0), (0, NUM_CLASSES_PAD - NUM_CLASSES)))
    pb = jnp.pad(p["pred"]["b"], ((0, 0), (0, NUM_CLASSES_PAD - NUM_CLASSES)))
    x = matmul_bias(x, pw, pb, out_dtype=jnp.bfloat16)             # bf16 logits halve resize read
    return x.reshape(B, h1, w1, NUM_CLASSES_PAD)


def segment_forward(params, x):
    """x: (B, 3, H, W) NCHW float32  ->  mask (1, B, H, W) float32."""
    B, C, H, W = x.shape
    r_pad = (MAX_TIMES - W % MAX_TIMES) % MAX_TIMES
    b_pad = (MAX_TIMES - H % MAX_TIMES) % MAX_TIMES
    x = jnp.transpose(x, (0, 2, 3, 1))                                     # NHWC once
    x = jnp.pad(x, ((0, 0), (0, b_pad), (0, r_pad), (0, 0)), mode="edge")  # replicate pad
    mean = jnp.array([0.485, 0.456, 0.406], jnp.float32).reshape(1, 1, 1, 3)
    std = jnp.array([0.229, 0.224, 0.225], jnp.float32).reshape(1, 1, 1, 3)
    x = (x - mean) / std

    feats = backbone_forward(params["backbone"], x)
    seg_logit = decode_head_forward(params["head"], feats)                 # (B, h1, w1, 256) bf16
    # Reference: interpolate to the original (H, W), softmax over classes, then argmax.
    # Softmax is monotone per pixel, so the argmax is computed directly and fused into the resize.
    mask = bilinear_resize_argmax(seg_logit, H, W, NUM_CLASSES)            # (B, H, W) int32
    mask = mask[None, ...]                                                 # (1, B, H, W)
    mask = jnp.clip(mask, 0, NUM_CLASSES).astype(jnp.float32)
    return mask


# =============================== parameters ===============================
# TODO(synk): checkpoint ('models/image_segment.pth') and the ADE20K label_mapping .npy are
# not loaded; parameters are synthetic, deterministically initialized below.

class _Rng:
    def __init__(self, seed):
        self._key = jax.random.PRNGKey(seed)

    def next(self):
        self._key, sub = jax.random.split(self._key)
        return sub


def _make_linear(rng, k, n, wscale=0.02):
    # matmul weights are stored in bf16 (halves HBM->VMEM DMA); biases stay f32.
    w = (jax.random.normal(rng.next(), (k, n), jnp.float32) * wscale).astype(jnp.bfloat16)
    b = jax.random.normal(rng.next(), (1, n), jnp.float32) * 0.01
    return {"w": w, "b": b}


def _make_ln(c):
    return {"g": jnp.ones((1, c), jnp.float32), "b": jnp.zeros((1, c), jnp.float32)}


def build_params(seed=42):
    rng = _Rng(seed)
    stages = []
    for s in range(4):
        cin, cout, k = IN_CHS[s], EMBED_DIMS[s], PATCH_SIZES[s]
        pe = {"proj": _make_linear(rng, k * k * cin, cout), "norm": _make_ln(cout)}
        blocks = []
        hid = cout * MLP_RATIOS[s]
        for _ in range(DEPTHS[s]):
            attn = {"q": _make_linear(rng, cout, cout),
                    "kv": _make_linear(rng, cout, 2 * cout),
                    "proj": _make_linear(rng, cout, cout)}
            if SR_RATIOS[s] > 1:
                sr = SR_RATIOS[s]
                attn["sr"] = _make_linear(rng, sr * sr * cout, cout)
                attn["norm"] = _make_ln(cout)
            mlpp = {"fc1": _make_linear(rng, cout, hid),
                    "dw_w": jax.random.normal(rng.next(), (9, hid), jnp.float32) * 0.02,
                    "dw_b": jax.random.normal(rng.next(), (1, hid), jnp.float32) * 0.01,
                    "fc2": _make_linear(rng, hid, cout)}
            blocks.append({"norm1": _make_ln(cout), "attn": attn,
                           "norm2": _make_ln(cout), "mlp": mlpp})
        stages.append({"patch_embed": pe, "blocks": blocks, "norm": _make_ln(cout)})

    # eval-mode BatchNorm with default init (gamma=1, beta=0, mean=0, var=1, eps=1e-5)
    # folded into the 1x1 fuse conv weight.
    bn_scale = float(1.0 / np.sqrt(1.0 + 1e-5))
    fuse_w = (jax.random.normal(rng.next(), (4 * EMBEDDING_DIM, EMBEDDING_DIM), jnp.float32)
              * 0.02 * bn_scale).astype(jnp.bfloat16)
    head = {
        "linear_c1": _make_linear(rng, EMBED_DIMS[0], EMBEDDING_DIM),
        "linear_c2": _make_linear(rng, EMBED_DIMS[1], EMBEDDING_DIM),
        "linear_c3": _make_linear(rng, EMBED_DIMS[2], EMBEDDING_DIM),
        "linear_c4": _make_linear(rng, EMBED_DIMS[3], EMBEDDING_DIM),
        "fuse": {"w": fuse_w, "b": jnp.zeros((1, EMBEDDING_DIM), jnp.float32)},
        "pred": _make_linear(rng, EMBEDDING_DIM, NUM_CLASSES),
    }
    return {"backbone": {"stages": stages}, "head": head}


# =============================== main ===============================

if __name__ == "__main__":
    params = build_params(seed=42)
    x = jax.random.uniform(jax.random.PRNGKey(0), (2, 3, 32, 32), jnp.float32)
    mask = segment_forward(params, x)
    mask = jax.block_until_ready(mask)
    assert mask.shape == (1, 2, 32, 32), mask.shape
    assert mask.dtype == jnp.float32
    print("KERNEL_OK")
</pallas_src>

<mosaic_0001>
module attributes {stable_mosaic.version = 11 : i64} {
  func.func @_mm_kernel(%arg0: i32, %arg1: i32, %arg2: i32, %arg3: memref<128x147xbf16, #tpu.memory_space<vmem>>, %arg4: memref<147x64xbf16, #tpu.memory_space<vmem>>, %arg5: memref<1x64xf32, #tpu.memory_space<vmem>>, %arg6: memref<128x64xf32, #tpu.memory_space<vmem>>, %arg7: memref<128x64xf32, #tpu.memory_space<vmem>>) attributes {dimension_semantics = [#tpu.dimension_semantics<parallel>, #tpu.dimension_semantics<parallel>, #tpu.dimension_semantics<arbitrary>], iteration_bounds = array<i64: 1, 1, 1>, scalar_prefetch = 0 : i64, scratch_operands = 1 : i64, tpu.core_type = #tpu.core_type<tc>, window_params = [{transform_indices = @transform_0, window_bounds = array<i64: 128, 147>}, {transform_indices = @transform_1, window_bounds = array<i64: 147, 64>}, {transform_indices = @transform_2, window_bounds = array<i64: 1, 64>}, {transform_indices = @transform_3, window_bounds = array<i64: 128, 64>}]} {
    %c0_i32 = arith.constant 0 : i32
    %0 = arith.cmpi eq, %arg2, %c0_i32 : i32
    %1 = arith.extui %0 : i1 to i32
    %c0_i32_0 = arith.constant 0 : i32
    %2 = arith.cmpi ne, %1, %c0_i32_0 : i32
    scf.if %2 {
      %cst_10 = arith.constant 0.000000e+00 : f32
      %12 = vector.broadcast %cst_10 : f32 to vector<128x64xf32>
      %c0_11 = arith.constant 0 : index
      %c0_12 = arith.constant 0 : index
      %13 = vector.load %arg7[%c0_11, %c0_12] : memref<128x64xf32, #tpu.memory_space<vmem>>, vector<128x64xf32>
      tpu.vector_store %arg7[%c0_11, %c0_12], %12 {strides = array<i32>} : memref<128x64xf32, #tpu.memory_space<vmem>>, vector<128x64xf32>,
    } else {
    }
    %c0 = arith.constant 0 : index
    %c0_1 = arith.constant 0 : index
    %3 = vector.load %arg3[%c0, %c0_1] : memref<128x147xbf16, #tpu.memory_space<vmem>>, vector<128x147xbf16>
    %c0_2 = arith.constant 0 : index
    %c0_3 = arith.constant 0 : index
    %4 = vector.load %arg7[%c0_2, %c0_3] : memref<128x64xf32, #tpu.memory_space<vmem>>, vector<128x64xf32>
    %c0_4 = arith.constant 0 : index
    %c0_5 = arith.constant 0 : index
    %5 = vector.load %arg4[%c0_4, %c0_5] : memref<147x64xbf16, #tpu.memory_space<vmem>>, vector<147x64xbf16>
    %cst = arith.constant dense<0.000000e+00> : vector<128x64xf32>
    %6 = tpu.matmul %3, %5, %cst {dimension_numbers = #tpu.dot_dimension_numbers<[1], [0], [0], [1], [0, 0, 1, 1], [], []>} : vector<128x147xbf16>, vector<147x64xbf16>, vector<128x64xf32> -> vector<128x64xf32>
    %7 = arith.addf %4, %6 : vector<128x64xf32>
    %c0_6 = arith.constant 0 : index
    %c0_7 = arith.constant 0 : index
    %8 = vector.load %arg7[%c0_6, %c0_7] : memref<128x64xf32, #tpu.memory_space<vmem>>, vector<128x64xf32>
    tpu.vector_store %arg7[%c0_6, %c0_7], %7 {strides = array<i32>} : memref<128x64xf32, #tpu.memory_space<vmem>>, vector<128x64xf32>,
    %c0_i32_8 = arith.constant 0 : i32
    %9 = arith.cmpi eq, %arg2, %c0_i32_8 : i32
    %10 = arith.extui %9 : i1 to i32
    %c0_i32_9 = arith.constant 0 : i32
    %11 = arith.cmpi ne, %10, %c0_i32_9 : i32
    scf.if %11 {
      %c0_10 = arith.constant 0 : index
      %c0_11 = arith.constant 0 : index
      %12 = vector.load %arg7[%c0_10, %c0_11] : memref<128x64xf32, #tpu.memory_space<vmem>>, vector<128x64xf32>
      %c0_12 = arith.constant 0 : index
      %c0_13 = arith.constant 0 : index
      %13 = vector.load %arg5[%c0_12, %c0_13] : memref<1x64xf32, #tpu.memory_space<vmem>>, vector<1x64xf32>
      %14 = vector.broadcast %13 : vector<1x64xf32> to vector<128x64xf32>
      %15 = arith.addf %12, %14 : vector<128x64xf32>
      %c0_14 = arith.constant 0 : index
      %c0_15 = arith.constant 0 : index
      %16 = vector.load %arg6[%c0_14, %c0_15] : memref<128x64xf32, #tpu.memory_space<vmem>>, vector<128x64xf32>
      tpu.vector_store %arg6[%c0_14, %c0_15], %15 {strides = array<i32>} : memref<128x64xf32, #tpu.memory_space<vmem>>, vector<128x64xf32>,
    } else {
    }
    return
  }
  func.func @transform_0(%arg0: i32, %arg1: i32, %arg2: i32) -> (i32, i32) {
    %c0_i32 = arith.constant 0 : i32
    return %arg0, %arg2 : i32, i32
  }
  func.func @transform_1(%arg0: i32, %arg1: i32, %arg2: i32) -> (i32, i32) {
    %c0_i32 = arith.constant 0 : i32
    return %arg2, %arg1 : i32, i32
  }
  func.func @transform_2(%arg0: i32, %arg1: i32, %arg2: i32) -> (i32, i32) {
    %c0_i32 = arith.constant 0 : i32
    %c0_i32_0 = arith.constant 0 : i32
    return %c0_i32, %arg1 : i32, i32
  }
  func.func @transform_3(%arg0: i32, %arg1: i32, %arg2: i32) -> (i32, i32) {
    %c0_i32 = arith.constant 0 : i32
    return %arg0, %arg1 : i32, i32
  }
}

</mosaic_0001>

<bundles_post_ra>
// kernel: tpu_custom_call.1
= control target key start
LH: loop header
LB: loop body
LE: loop exit
PB: predicated region body
PF: predicated region fallthrough
CT: control target
= control target key end

     0   :  { %v532_v0 = vmov 0   ;;  %vm19_vm0 = vcmask 523264   ;;  %v533_v3 = vmov 0.0   ;;  %vm216_vm1 = vcmask 154624   ;;  %s778_s1 = inlined_call_operand.vmem [shape: bf16[147,64], index: 1, kind: input, shape index: {}]   ;;  %s779_s0 = inlined_call_operand.vmem [shape: bf16[128,147], index: 0, kind: input, shape index: {}]   ;;  %s780_s2 = inlined_call_operand.vmem [shape: f32[1,64], index: 2, kind: input, shape index: {}]   ;;  %s781_s3 = inlined_call_operand.vmem [shape: f32[128,64], index: 3, kind: output, shape index: {}]  }
   0x1   :  { %248 = vmatprep.subr.bf16.mxu0 %v532_v0  ;;  %475 = vmatprep.subr.bf16.mxu1 %v532_v0  ;;  %v498_v1 = vld [vmem:[%s778_s1] sm:$0xff]   ;;  %v499_v2 = vld [vmem:[%s778_s1 + $0x8] sm:$0xff]   ;;  %20 = vst.msk [vmem:[#allocation2] sm:$0xff] %vm19_vm0, %v533_v3  ;;  %21 = vst.msk [vmem:[#allocation2 + $0x8] sm:$0xff] %vm19_vm0, %v533_v3  ;;  %vm241_vm2 = vcmask 1040384   ;;  %vm242_vm3 = vcmask 1041408  }
   0x2   :  { %249 = vmatpush1.bf16.msra.mxu0 %v498_v1  ;;  %485 = vmatpush1.bf16.msra.mxu1 %v498_v1  ;;  %22 = vst.msk [vmem:[#allocation2 + $0x10] sm:$0xff] %vm19_vm0, %v533_v3  ;;  %23 = vst.msk [vmem:[#allocation2 + $0x18] sm:$0xff] %vm19_vm0, %v533_v3  ;;  %v500_v4 = vld [vmem:[%s778_s1 + $0x10] sm:$0xff]   ;;  %v501_v5 = vld [vmem:[%s778_s1 + $0x18] sm:$0xff]   ;;  %v534_v12 = vmov 65535  }
   0x3   :  { %250 = vmatprep.subr.bf16.mxu0 %v532_v0  ;;  %476 = vmatprep.subr.bf16.mxu1 %v532_v0  ;;  %24 = vst.msk [vmem:[#allocation2 + $0x20] sm:$0xff] %vm19_vm0, %v533_v3  ;;  %25 = vst.msk [vmem:[#allocation2 + $0x28] sm:$0xff] %vm19_vm0, %v533_v3  ;;  %v510_v6 = vld [vmem:[%s779_s0 + $0x4] ss:$8 sps:$4 sm:$0xff]   ;;  %v504_v10 = vld [vmem:[%s778_s1 + $0x30] sm:$0xff]   ;;  %v243_v13 = vsel %vm241_vm2, 4294967295, %v534_v12 }
   0x4   :  { %26 = vst.msk [vmem:[#allocation2 + $0x30] sm:$0xff] %vm19_vm0, %v533_v3  ;;  %27 = vst.msk [vmem:[#allocation2 + $0x38] sm:$0xff] %vm19_vm0, %v533_v3  ;;  %466 = vmatprep.mubr.msk.bf16.mxu0 %vm216_vm1, %v510_v6  ;;  %v513_v7 = vld [vmem:[%s779_s0 + $0x44] ss:$8 sps:$4 sm:$0xff]   ;;  %v505_v11 = vld [vmem:[%s778_s1 + $0x38] sm:$0xff]   ;;  %v244_v16 = vsel %vm242_vm3, %v243_v13, 0 }
   0x5   :  { %28 = vst.msk [vmem:[#allocation2 + $0x40] sm:$0xff] %vm19_vm0, %v533_v3  ;;  %29 = vst.msk [vmem:[#allocation2 + $0x48] sm:$0xff] %vm19_vm0, %v533_v3  ;;  %v502_v8 = vld [vmem:[%s778_s1 + $0x20] sm:$0xff]   ;;  %470 = vmatprep.mubr.msk.bf16.mxu1 %vm216_vm1, %v513_v7  ;;  %v503_v9 = vld [vmem:[%s778_s1 + $0x28] sm:$0xff]  }
   0x6   :  { %30 = vst.msk [vmem:[#allocation2 + $0x50] sm:$0xff] %vm19_vm0, %v533_v3  ;;  %31 = vst.msk [vmem:[#allocation2 + $0x58] sm:$0xff] %vm19_vm0, %v533_v3  ;;  %251 = vmatpush1.bf16.msra.mxu0 %v499_v2  ;;  %486 = vmatpush1.bf16.msra.mxu1 %v499_v2  ;;  %v506_v14 = vld [vmem:[%s778_s1 + $0x40] sm:$0xff]   ;;  %v507_v15 = vld [vmem:[%s778_s1 + $0x48] ss:$0 sps:$4 sm:$0x33]  }
   0x7   :  { %32 = vst.msk [vmem:[#allocation2 + $0x60] sm:$0xff] %vm19_vm0, %v533_v3  ;;  %33 = vst.msk [vmem:[#allocation2 + $0x68] sm:$0xff] %vm19_vm0, %v533_v3  ;;  %252 = vmatprep.subr.bf16.mxu0 %v532_v0  ;;  %477 = vmatprep.subr.bf16.mxu1 %v532_v0  ;;  %v246_v17 = vand.u32 %v507_v15, %v244_v16  ;;  %v508_v18 = vld [vmem:[%s779_s0] ss:$8 sps:$4 sm:$0xff]   ;;  %v514_v20 = vld [vmem:[%s779_s0 + $0x14] ss:$8 sps:$4 sm:$0xff]  }
   0x8   :  { %34 = vst.msk [vmem:[#allocation2 + $0x70] sm:$0xff] %vm19_vm0, %v533_v3  ;;  %35 = vst.msk [vmem:[#allocation2 + $0x78] sm:$0xff] %vm19_vm0, %v533_v3  ;;  %v511_v19 = vld [vmem:[%s779_s0 + $0x40] ss:$8 sps:$4 sm:$0xff]   ;;  %v516_v21 = vld [vmem:[%s779_s0 + $0x54] ss:$8 sps:$4 sm:$0xff]  }
   0x9   :  { %v518_v22 = vld [vmem:[%s779_s0 + $0x10] ss:$8 sps:$4 sm:$0xff]   ;;  %v520_v24 = vld [vmem:[%s779_s0 + $0x24] ss:$8 sps:$4 sm:$0xff]   ;;  %v524_v26 = vld [vmem:[%s779_s0 + $0x20] ss:$8 sps:$4 sm:$0xff]  }
   0xa   :  { %253 = vmatpush1.bf16.msra.mxu0 %v500_v4  ;;  %487 = vmatpush1.bf16.msra.mxu1 %v500_v4  ;;  %v519_v23 = vld [vmem:[%s779_s0 + $0x50] ss:$8 sps:$4 sm:$0xff]   ;;  %v522_v25 = vld [vmem:[%s779_s0 + $0x64] ss:$8 sps:$4 sm:$0xff]   ;;  %v525_v27 = vld [vmem:[%s779_s0 + $0x60] ss:$8 sps:$4 sm:$0xff]  }
   0xb   :  { %254 = vmatprep.subr.bf16.mxu0 %v532_v0  ;;  %478 = vmatprep.subr.bf16.mxu1 %v532_v0  ;;  %v526_v28 = vld [vmem:[%s779_s0 + $0x34] ss:$8 sps:$4 sm:$0xff]   ;;  %v530_v30 = vld [vmem:[%s779_s0 + $0x30] ss:$8 sps:$4 sm:$0xff]   ;;  %v52_v32 = vld [vmem:[#allocation2] sm:$0xff] }
   0xc   :  { %v528_v29 = vld [vmem:[%s779_s0 + $0x74] ss:$8 sps:$4 sm:$0xff]   ;;  %v531_v31 = vld [vmem:[%s779_s0 + $0x70] ss:$8 sps:$4 sm:$0xff]   ;;  %v60_v33 = vld [vmem:[#allocation2 + $0x40] sm:$0xff] }
   0xd   :  { %v53_v36 = vld [vmem:[#allocation2 + $0x8] sm:$0xff]  ;;  %v54_v48 = vld [vmem:[#allocation2 + $0x10] sm:$0xff]  ;;  %v684_v50 = vld [vmem:[%s780_s2] ss:$0 sm:$0xff] }
   0xe   :  { %255 = vmatpush1.bf16.msra.mxu0 %v501_v5  ;;  %488 = vmatpush1.bf16.msra.mxu1 %v501_v5  ;;  %v61_v37 = vld [vmem:[#allocation2 + $0x48] sm:$0xff]  ;;  %v62_v49 = vld [vmem:[#allocation2 + $0x50] sm:$0xff]  ;;  %v55_v53 = vld [vmem:[#allocation2 + $0x18] sm:$0xff] }
   0xf   :  { %256 = vmatprep.subr.bf16.mxu0 %v532_v0  ;;  %479 = vmatprep.subr.bf16.mxu1 %v532_v0  ;;  %v63_v54 = vld [vmem:[#allocation2 + $0x58] sm:$0xff]  ;;  %v57_v13 = vld [vmem:[#allocation2 + $0x28] sm:$0xff] }
  0x12   :  { %257 = vmatpush1.bf16.msra.mxu0 %v502_v8  ;;  %489 = vmatpush1.bf16.msra.mxu1 %v502_v8 }
  0x13   :  { %258 = vmatprep.subr.bf16.mxu0 %v532_v0  ;;  %480 = vmatprep.subr.bf16.mxu1 %v532_v0 }
  0x16   :  { %259 = vmatpush1.bf16.msra.mxu0 %v503_v9  ;;  %490 = vmatpush1.bf16.msra.mxu1 %v503_v9  ;;  %v56_v9 = vld [vmem:[#allocation2 + $0x20] sm:$0xff] }
  0x17   :  { %260 = vmatprep.subr.bf16.mxu0 %v532_v0  ;;  %481 = vmatprep.subr.bf16.mxu1 %v532_v0 }
  0x1a   :  { %261 = vmatpush1.bf16.msra.mxu0 %v504_v10  ;;  %491 = vmatpush1.bf16.msra.mxu1 %v504_v10  ;;  %v64_v10 = vld [vmem:[#allocation2 + $0x60] sm:$0xff] }
  0x1b   :  { %262 = vmatprep.subr.bf16.mxu0 %v532_v0  ;;  %482 = vmatprep.subr.bf16.mxu1 %v532_v0 }
  0x1e   :  { %263 = vmatpush1.bf16.msra.mxu0 %v505_v11  ;;  %492 = vmatpush1.bf16.msra.mxu1 %v505_v11 }
  0x1f   :  { %264 = vmatprep.subr.bf16.mxu0 %v532_v0  ;;  %483 = vmatprep.subr.bf16.mxu1 %v532_v0 }
  0x22   :  { %265 = vmatpush1.bf16.msra.mxu0 %v506_v14  ;;  %493 = vmatpush1.bf16.msra.mxu1 %v506_v14  ;;  %v65_v14 = vld [vmem:[#allocation2 + $0x68] sm:$0xff] }
  0x23   :  { %266 = vmatprep.subr.bf16.mxu0 %v532_v0  ;;  %484 = vmatprep.subr.bf16.mxu1 %v532_v0 }
  0x26   :  { %267 = vmatpush1.bf16.msra.mxu0 %v246_v17  ;;  %494 = vmatpush1.bf16.msra.mxu1 %v246_v17 }
  0x29   :  { %281 = vmatmul.mubr.bf16.vlgmr.msra.gmra.mrb[0].mxu0 %v508_v18  ;;  %313 = vmatmul.mubr.bf16.vlgmr.msra.gmra.mrb[0].mxu1 %v511_v19 }
  0x2a   :  { %467 = vmatprep.mubr.msk.bf16.mxu0 %vm216_vm1, %v514_v20  ;;  %471 = vmatprep.mubr.msk.bf16.mxu1 %vm216_vm1, %v516_v21 }
  0x31   :  { %289 = vmatmul.mubr.bf16.gmra.mrb[4].mxu0 %v518_v22  ;;  %321 = vmatmul.mubr.bf16.gmra.mrb[4].mxu1 %v519_v23 }
  0x32   :  { %468 = vmatprep.mubr.msk.bf16.mxu0 %vm216_vm1, %v520_v24  ;;  %472 = vmatprep.mubr.msk.bf16.mxu1 %vm216_vm1, %v522_v25 }
  0x39   :  { %297 = vmatmul.mubr.bf16.gmra.mrb[8].mxu0 %v524_v26  ;;  %329 = vmatmul.mubr.bf16.gmra.mrb[8].mxu1 %v525_v27 }
  0x3a   :  { %469 = vmatprep.mubr.msk.bf16.mxu0 %vm216_vm1, %v526_v28  ;;  %473 = vmatprep.mubr.msk.bf16.mxu1 %vm216_vm1, %v528_v29 }
  0x41   :  { %305 = vmatmul.mubr.bf16.gmra.mrb[12].mxu0 %v530_v30  ;;  %337 = vmatmul.mubr.bf16.gmra.mrb[12].mxu1 %v531_v31 }
  0xfc   :  { %v282_v34 = vpop.f32.mrb[0].mxu0  ;;  %v314_v35 = vpop.f32.mrb[0].mxu1 }
  0xfd   :  { %v345_v38 = vadd.f32 %v282_v34, %v52_v32  ;;  %v353_v39 = vadd.f32 %v314_v35, %v60_v33  ;;  %v284_v40 = vpop.f32.mrb[1].mxu0  ;;  %v316_v41 = vpop.f32.mrb[1].mxu1  ;;  %v58_v33 = vld [vmem:[#allocation2 + $0x30] sm:$0xff] }
  0xfe   :  { %v285_v42 = vpop.f32.mrb[2].mxu0  ;;  %v317_v43 = vpop.f32.mrb[2].mxu1  ;;  %v66_v34 = vld [vmem:[#allocation2 + $0x70] sm:$0xff] }
  0xff   :  { %362 = vst.msk [vmem:[#allocation2] sm:$0xff] %vm19_vm0, %v345_v38  ;;  %370 = vst.msk [vmem:[#allocation2 + $0x40] sm:$0xff] %vm19_vm0, %v353_v39  ;;  %v346_v44 = vadd.f32 %v285_v42, %v53_v36  ;;  %v354_v45 = vadd.f32 %v317_v43, %v61_v37  ;;  %v287_v46 = vpop.f32.mrb[3].mxu0  ;;  %v319_v47 = vpop.f32.mrb[3].mxu1  ;;  %v59_v37 = vld [vmem:[#allocation2 + $0x38] sm:$0xff] }
 0x100   :  { %v67_v38 = vld [vmem:[#allocation2 + $0x78] sm:$0xff] }
 0x101   :  { %363 = vst.msk [vmem:[#allocation2 + $0x8] sm:$0xff] %vm19_vm0, %v346_v44  ;;  %371 = vst.msk [vmem:[#allocation2 + $0x48] sm:$0xff] %vm19_vm0, %v354_v45 }
 0x104   :  { %v290_v51 = vpop.f32.mrb[4].mxu0  ;;  %v322_v52 = vpop.f32.mrb[4].mxu1 }
 0x105   :  { %v347_v55 = vadd.f32 %v290_v51, %v54_v48  ;;  %v355_v56 = vadd.f32 %v322_v52, %v62_v49  ;;  %v292_v57 = vpop.f32.mrb[5].mxu0  ;;  %v324_v58 = vpop.f32.mrb[5].mxu1 }
 0x106   :  { %v381_v59 = vld [vmem:[#allocation2] sm:$0xff]  ;;  %v293_v61 = vpop.f32.mrb[6].mxu0  ;;  %v325_v62 = vpop.f32.mrb[6].mxu1 }
 0x107   :  { %v389_v60 = vld [vmem:[#allocation2 + $0x40] sm:$0xff]  ;;  %v404_v63 = vadd.f32 %v684_v50, %v381_v59  ;;  %364 = vst.msk [vmem:[#allocation2 + $0x10] sm:$0xff] %vm19_vm0, %v347_v55  ;;  %372 = vst.msk [vmem:[#allocation2 + $0x50] sm:$0xff] %vm19_vm0, %v355_v56  ;;  %v348_v1 = vadd.f32 %v293_v61, %v55_v53  ;;  %v356_v2 = vadd.f32 %v325_v62, %v63_v54  ;;  %v295_v3 = vpop.f32.mrb[7].mxu0  ;;  %v327_v4 = vpop.f32.mrb[7].mxu1 }
 0x108   :  { %v412_v0 = vadd.f32 %v684_v50, %v389_v60  ;;  %v382_v5 = vld [vmem:[#allocation2 + $0x8] sm:$0xff] }
 0x109   :  { %v390_v6 = vld [vmem:[#allocation2 + $0x48] sm:$0xff]  ;;  %420 = vst.msk [vmem:[%s781_s3] sm:$0xff] %vm19_vm0, %v404_v63  ;;  %v405_v7 = vadd.f32 %v684_v50, %v382_v5  ;;  %365 = vst.msk [vmem:[#allocation2 + $0x18] sm:$0xff] %vm19_vm0, %v348_v1 }
 0x10a   :  { %428 = vst.msk [vmem:[%s781_s3 + $0x40] sm:$0xff] %vm19_vm0, %v412_v0  ;;  %v413_v8 = vadd.f32 %v684_v50, %v390_v6  ;;  %373 = vst.msk [vmem:[#allocation2 + $0x58] sm:$0xff] %vm19_vm0, %v356_v2 }
 0x10b   :  { %421 = vst.msk [vmem:[%s781_s3 + $0x8] sm:$0xff] %vm19_vm0, %v405_v7 }
 0x10c   :  { %429 = vst.msk [vmem:[%s781_s3 + $0x48] sm:$0xff] %vm19_vm0, %v413_v8  ;;  %v298_v11 = vpop.f32.mrb[8].mxu0  ;;  %v330_v12 = vpop.f32.mrb[8].mxu1 }
 0x10d   :  { %v349_v15 = vadd.f32 %v298_v11, %v56_v9  ;;  %v357_v16 = vadd.f32 %v330_v12, %v64_v10  ;;  %v300_v17 = vpop.f32.mrb[9].mxu0  ;;  %v332_v18 = vpop.f32.mrb[9].mxu1 }
 0x10e   :  { %v383_v19 = vld [vmem:[#allocation2 + $0x10] sm:$0xff]  ;;  %v301_v21 = vpop.f32.mrb[10].mxu0  ;;  %v333_v22 = vpop.f32.mrb[10].mxu1 }
 0x10f   :  { %v391_v20 = vld [vmem:[#allocation2 + $0x50] sm:$0xff]  ;;  %v406_v23 = vadd.f32 %v684_v50, %v383_v19  ;;  %366 = vst.msk [vmem:[#allocation2 + $0x20] sm:$0xff] %vm19_vm0, %v349_v15  ;;  %374 = vst.msk [vmem:[#allocation2 + $0x60] sm:$0xff] %vm19_vm0, %v357_v16  ;;  %v350_v25 = vadd.f32 %v301_v21, %v57_v13  ;;  %v358_v26 = vadd.f32 %v333_v22, %v65_v14  ;;  %v303_v27 = vpop.f32.mrb[11].mxu0  ;;  %v335_v28 = vpop.f32.mrb[11].mxu1 }
 0x110   :  { %v414_v24 = vadd.f32 %v684_v50, %v391_v20  ;;  %v384_v29 = vld [vmem:[#allocation2 + $0x18] sm:$0xff] }
 0x111   :  { %v392_v30 = vld [vmem:[#allocation2 + $0x58] sm:$0xff]  ;;  %422 = vst.msk [vmem:[%s781_s3 + $0x10] sm:$0xff] %vm19_vm0, %v406_v23  ;;  %v407_v31 = vadd.f32 %v684_v50, %v384_v29  ;;  %367 = vst.msk [vmem:[#allocation2 + $0x28] sm:$0xff] %vm19_vm0, %v350_v25 }
 0x112   :  { %430 = vst.msk [vmem:[%s781_s3 + $0x50] sm:$0xff] %vm19_vm0, %v414_v24  ;;  %v415_v32 = vadd.f32 %v684_v50, %v392_v30  ;;  %375 = vst.msk [vmem:[#allocation2 + $0x68] sm:$0xff] %vm19_vm0, %v358_v26 }
 0x113   :  { %423 = vst.msk [vmem:[%s781_s3 + $0x18] sm:$0xff] %vm19_vm0, %v407_v31 }
 0x114   :  { %431 = vst.msk [vmem:[%s781_s3 + $0x58] sm:$0xff] %vm19_vm0, %v415_v32  ;;  %v306_v35 = vpop.f32.mrb[12].mxu0  ;;  %v338_v36 = vpop.f32.mrb[12].mxu1 }
 0x115   :  { %v351_v39 = vadd.f32 %v306_v35, %v58_v33  ;;  %v359_v40 = vadd.f32 %v338_v36, %v66_v34  ;;  %v308_v41 = vpop.f32.mrb[13].mxu0  ;;  %v340_v42 = vpop.f32.mrb[13].mxu1 }
 0x116   :  { %v385_v43 = vld [vmem:[#allocation2 + $0x20] sm:$0xff]  ;;  %v309_v45 = vpop.f32.mrb[14].mxu0  ;;  %v341_v46 = vpop.f32.mrb[14].mxu1 }
 0x117   :  { %v393_v44 = vld [vmem:[#allocation2 + $0x60] sm:$0xff]  ;;  %v408_v47 = vadd.f32 %v684_v50, %v385_v43  ;;  %368 = vst.msk [vmem:[#allocation2 + $0x30] sm:$0xff] %vm19_vm0, %v351_v39  ;;  %376 = vst.msk [vmem:[#allocation2 + $0x70] sm:$0xff] %vm19_vm0, %v359_v40  ;;  %v352_v49 = vadd.f32 %v309_v45, %v59_v37  ;;  %v360_v51 = vadd.f32 %v341_v46, %v67_v38  ;;  %v311_v52 = vpop.f32.mrb[15].mxu0  ;;  %v343_v53 = vpop.f32.mrb[15].mxu1 }
 0x118   :  { %v416_v48 = vadd.f32 %v684_v50, %v393_v44  ;;  %v386_v54 = vld [vmem:[#allocation2 + $0x28] sm:$0xff] }
 0x119   :  { %v394_v55 = vld [vmem:[#allocation2 + $0x68] sm:$0xff]  ;;  %424 = vst.msk [vmem:[%s781_s3 + $0x20] sm:$0xff] %vm19_vm0, %v408_v47  ;;  %v409_v56 = vadd.f32 %v684_v50, %v386_v54  ;;  %369 = vst.msk [vmem:[#allocation2 + $0x38] sm:$0xff] %vm19_vm0, %v352_v49 }
 0x11a   :  { %432 = vst.msk [vmem:[%s781_s3 + $0x60] sm:$0xff] %vm19_vm0, %v416_v48  ;;  %v417_v57 = vadd.f32 %v684_v50, %v394_v55  ;;  %377 = vst.msk [vmem:[#allocation2 + $0x78] sm:$0xff] %vm19_vm0, %v360_v51 }
 0x11b   :  { %425 = vst.msk [vmem:[%s781_s3 + $0x28] sm:$0xff] %vm19_vm0, %v409_v56 }
 0x11c   :  { %433 = vst.msk [vmem:[%s781_s3 + $0x68] sm:$0xff] %vm19_vm0, %v417_v57 }
 0x11e   :  { %v387_v58 = vld [vmem:[#allocation2 + $0x30] sm:$0xff] }
 0x11f   :  { %v395_v59 = vld [vmem:[#allocation2 + $0x70] sm:$0xff]  ;;  %v410_v60 = vadd.f32 %v684_v50, %v387_v58 }
 0x120   :  { %v418_v61 = vadd.f32 %v684_v50, %v395_v59  ;;  %v388_v62 = vld [vmem:[#allocation2 + $0x38] sm:$0xff] }
 0x121   :  { %v396_v63 = vld [vmem:[#allocation2 + $0x78] sm:$0xff]  ;;  %426 = vst.msk [vmem:[%s781_s3 + $0x30] sm:$0xff] %vm19_vm0, %v410_v60  ;;  %v411_v0 = vadd.f32 %v684_v50, %v388_v62 }
 0x122   :  { %434 = vst.msk [vmem:[%s781_s3 + $0x70] sm:$0xff] %vm19_vm0, %v418_v61  ;;  %v419_v1 = vadd.f32 %v684_v50, %v396_v63 }
 0x123   :  { %427 = vst.msk [vmem:[%s781_s3 + $0x38] sm:$0xff] %vm19_vm0, %v411_v0 }
 0x124   :  { %435 = vst.msk [vmem:[%s781_s3 + $0x78] sm:$0xff] %vm19_vm0, %v419_v1 }

</bundles_post_ra>
